<compile_context>
chip_gen: v5e
topology: v5e:2x2
jax: 0.10.0
libtpu: 0.0.40
codegen_flags: <defaults>
</compile_context>

<pallas_src>
import jax
import jax.numpy as jnp
import numpy as np
from jax.experimental import pallas as pl
from jax.experimental.pallas import tpu as pltpu


# Keep the stacked (T, 3*Cpk) @ (3*Cpk, 2*Cout) single-dot conv only while the
# contraction fits one MXU pass (256 deep on v6e/v7x; v5e would prefer 128).
_STACK_K_MAX = 256


def _pack_conv_weight(w):
    """Fold a k=3 'same' Conv1d weight (3, C, D) into the packed time-by-2 domain.

    With packed rows P[t] = [z[2t], z[2t+1]] (2C) and Q[t] = [out[2t], out[2t+1]]
    (2D), the logical conv  out[l] = z[l-1]@W0 + z[l]@W1 + z[l+1]@W2  becomes
        Q[t] = P[t-1] @ A + P[t] @ B + P[t+1] @ C     (zero rows at t=-1, T)
    with A = [[0,0],[W0,0]], B = [[W1,W0],[W2,W1]], C = [[0,W2],[0,0]].
    Returns the taps stacked as (3*2C, 2D) in [prev; curr; next] order so the
    conv can be a single dot against concat([P[t-1], P[t], P[t+1]], lanes).
    """
    w0, w1, w2 = w[0], w[1], w[2]
    c, d = w0.shape
    z = jnp.zeros((c, d), w.dtype)
    a = jnp.concatenate([jnp.concatenate([z, z], 1),
                         jnp.concatenate([w0, z], 1)], 0)
    b = jnp.concatenate([jnp.concatenate([w1, w0], 1),
                         jnp.concatenate([w2, w1], 1)], 0)
    cm = jnp.concatenate([jnp.concatenate([z, w2], 1),
                          jnp.concatenate([z, z], 1)], 0)
    return jnp.concatenate([a, b, cm], axis=0)


def _vmem_limit_bytes(default=48 * 1024 * 1024):
    # Generation-aware VMEM budget: ~102 MiB on 128 MiB parts (v5e/v6e),
    # ~51 MiB on v7x (64 MiB physical).  Falls back to a safe 48 MiB.
    try:
        cap = int(pltpu.get_tpu_info().vmem_capacity_bytes)
        return max(default, min(int(cap * 0.8), cap - (4 << 20)))
    except Exception:
        return default


# ----------------------------------------------------------------------------
# Fused DecoderBlock forward.
# ----------------------------------------------------------------------------
def decoder_block_forward(params, x, seq_lens, residual):
    B, T, Cin = x.shape
    L = 2 * T
    Br, Lr, Cres = residual.shape
    assert Br == B and Lr == L, (residual.shape, x.shape)

    cdt = jnp.bfloat16  # MXU-native dtype for weights / dot inputs.

    w_up, b_up = params["up_w"], params["up_b"]          # (2, Cin, Cup), (1, Cup)
    Cup = w_up.shape[-1]

    # Packed transposed-conv: u[t] = [x[t]@W0 + b, x[t]@W1 + b]  (one dot).
    wu = jnp.concatenate([w_up[0], w_up[1]], axis=-1).astype(cdt)   # (Cin, 2Cup)
    bu = jnp.concatenate([b_up, b_up], axis=-1).astype(cdt)         # (1, 2Cup)

    conv_ws = [w for (w, _) in params["convs"]]          # each (3, Cin_i, Cout_i)
    conv_bs = [b for (_, b) in params["convs"]]          # each (1, Cout_i)
    n_convs = len(conv_ws)
    C1 = conv_ws[0].shape[-1]
    Cout_last = conv_ws[-1].shape[-1]

    # First conv: split weight rows into the upsample part and the residual
    # part so the U-Net channel concat never materializes in VMEM.
    w1 = conv_ws[0]
    w1y = _pack_conv_weight(w1[:, :Cup, :]).astype(cdt)   # (6*Cup, 2*C1)
    w1r = _pack_conv_weight(w1[:, Cup:, :]).astype(cdt)   # (6*Cres, 2*C1)
    b1 = jnp.concatenate([conv_bs[0], conv_bs[0]], axis=-1).astype(cdt)
    rest_ws = [_pack_conv_weight(w).astype(cdt) for w in conv_ws[1:]]
    rest_bs = [jnp.concatenate([b, b], axis=-1).astype(cdt) for b in conv_bs[1:]]

    # Free row-major repack of the residual into the packed time-by-2 domain.
    r_packed = residual.reshape(B, T, 2 * Cres)

    def kernel(sl_ref, x_ref, r_ref, wu_ref, bu_ref, w1y_ref, w1r_ref, b1_ref,
               *rest):
        o_ref = rest[-1]
        conv_refs = rest[:-1]
        bi = pl.program_id(0)
        sl = sl_ref[bi]

        # Hoisted predicates (packed row t holds logical rows 2t, 2t+1; the
        # MaskedLayer threshold 2*sl is even, so "packed row < sl" is exact).
        row = jax.lax.broadcasted_iota(jnp.int32, (T, 1), 0)
        valid = row < sl
        first = row == 0
        last = row == T - 1

        def conv3(z, w_ref):
            # k=3 'same' conv over packed rows; zero padding at t=-1 and t=T.
            zp = jnp.where(first, 0.0, jnp.roll(z, 1, axis=0))    # P[t-1]
            zn = jnp.where(last, 0.0, jnp.roll(z, -1, axis=0))    # P[t+1]
            c = z.shape[-1]
            if 3 * c <= _STACK_K_MAX:
                stack = jnp.concatenate([zp, z, zn], axis=-1).astype(w_ref.dtype)
                return jnp.dot(stack, w_ref[...],
                               preferred_element_type=jnp.float32)
            w = w_ref[...]
            return (jnp.dot(zp.astype(w.dtype), w[0:c],
                            preferred_element_type=jnp.float32)
                    + jnp.dot(z.astype(w.dtype), w[c:2 * c],
                              preferred_element_type=jnp.float32)
                    + jnp.dot(zn.astype(w.dtype), w[2 * c:3 * c],
                              preferred_element_type=jnp.float32))

        # --- masked transposed-conv upsample (packed): one dot, no interleave.
        xb = x_ref[...].astype(wu_ref.dtype)
        u = jnp.dot(xb, wu_ref[...], preferred_element_type=jnp.float32)
        u = u + bu_ref[...].astype(jnp.float32)
        u = jnp.where(valid, u, 0.0)                              # MaskedLayer

        # --- first conv: skip-connection handled by two accumulating dots ----
        r = r_ref[...].astype(jnp.float32)
        z = conv3(u, w1y_ref) + conv3(r, w1r_ref) + b1_ref[...].astype(jnp.float32)
        z = jnp.where(valid, z, 0.0)                              # MaskedLayer

        # --- remaining k=3 convs ---------------------------------------------
        for i in range(len(conv_refs) // 2):
            w_ref = conv_refs[2 * i]
            b_ref = conv_refs[2 * i + 1]
            z = conv3(z, w_ref) + b_ref[...].astype(jnp.float32)
            z = jnp.where(valid, z, 0.0)                          # MaskedLayer

        o_ref[...] = z.astype(o_ref.dtype)

    in_specs = [
        pl.BlockSpec((pl.Squeezed(), T, Cin), lambda b, sl: (b, 0, 0)),
        pl.BlockSpec((pl.Squeezed(), T, 2 * Cres), lambda b, sl: (b, 0, 0)),
    ]
    args = [x, r_packed]
    weight_args = [wu, bu, w1y, w1r, b1]
    for w_i, b_i in zip(rest_ws, rest_bs):
        weight_args += [w_i, b_i]
    for wmat in weight_args:
        in_specs.append(pl.BlockSpec(wmat.shape, lambda b, sl: (0, 0)))
        args.append(wmat)

    # Advisory cost estimate for XLA scheduling of the fused custom call.
    mat_kn = [(Cin, 2 * Cup), (6 * Cup, 2 * C1), (6 * Cres, 2 * C1)]
    for i in range(1, n_convs):
        mat_kn.append((6 * conv_ws[i - 1].shape[-1], 2 * conv_ws[i].shape[-1]))
    flops = 2 * B * T * sum(k * n for k, n in mat_kn)
    bytes_accessed = (x.size * x.dtype.itemsize
                      + residual.size * residual.dtype.itemsize
                      + sum(w.size * w.dtype.itemsize for w in weight_args)
                      + B * T * 2 * Cout_last * x.dtype.itemsize)

    out_packed = pl.pallas_call(
        kernel,
        out_shape=jax.ShapeDtypeStruct((B, T, 2 * Cout_last), x.dtype),
        grid_spec=pltpu.PrefetchScalarGridSpec(
            num_scalar_prefetch=1,
            grid=(B,),
            in_specs=in_specs,
            out_specs=pl.BlockSpec((pl.Squeezed(), T, 2 * Cout_last),
                                   lambda b, sl: (b, 0, 0)),
        ),
        compiler_params=pltpu.CompilerParams(
            dimension_semantics=("parallel",),     # batch elems independent
            vmem_limit_bytes=_vmem_limit_bytes(),
        ),
        cost_estimate=pl.CostEstimate(flops=flops, transcendentals=0,
                                      bytes_accessed=bytes_accessed),
    )(seq_lens, *args)

    # Free row-major unpack back to the logical (B, 2T, Cout) layout.
    out = out_packed.reshape(B, L, Cout_last)
    return out, seq_lens * 2


# ----------------------------------------------------------------------------
# Deterministic parameter init (f32 master copies; kernel uses bf16).
# ----------------------------------------------------------------------------
def init_params(key, c_in, c_up, c_res, conv_channels):
    keys = jax.random.split(key, 2 + 2 * len(conv_channels))
    up_w = jax.random.normal(keys[0], (2, c_in, c_up), jnp.float32) / np.sqrt(c_in)
    up_b = jax.random.normal(keys[1], (1, c_up), jnp.float32) * 0.01
    convs = []
    cin = c_up + c_res
    for i, cout in enumerate(conv_channels):
        w = jax.random.normal(keys[2 + 2 * i], (3, cin, cout), jnp.float32)
        w = w / np.sqrt(3 * cin)
        b = jax.random.normal(keys[3 + 2 * i], (1, cout), jnp.float32) * 0.01
        convs.append((w, b))
        cin = cout
    return {"up_w": up_w, "up_b": up_b, "convs": convs}


# Pure-JAX reference of the same semantics in the LOGICAL (2T) domain, using
# the same bf16-at-dot / f32-accumulate arithmetic so it independently checks
# the packed-domain algebra of the kernel.
def ref_forward(params, x, seq_lens, residual):
    cdt = jnp.bfloat16

    def mask(y, sl):
        t = jnp.arange(y.shape[1])[None, :, None]
        return jnp.where(t < sl[:, None, None], y, jnp.zeros_like(y))

    B, T, _ = x.shape
    xb = x.astype(cdt)
    w0 = params["up_w"][0].astype(cdt)
    w1 = params["up_w"][1].astype(cdt)
    bu = params["up_b"].astype(cdt).astype(jnp.float32)
    e = jnp.einsum("btc,cd->btd", xb, w0, preferred_element_type=jnp.float32) + bu
    o = jnp.einsum("btc,cd->btd", xb, w1, preferred_element_type=jnp.float32) + bu
    y = jnp.stack([e, o], axis=2).reshape(B, 2 * T, -1)
    sl = seq_lens * 2
    y = mask(y, sl)
    y = jnp.concatenate([y, residual.astype(jnp.float32)], axis=-1)
    for (w, b) in params["convs"]:
        wb = w.astype(cdt)
        bb = b.astype(cdt).astype(jnp.float32)
        yp = jnp.pad(y, ((0, 0), (1, 1), (0, 0))).astype(cdt)
        y = (jnp.einsum("btc,cd->btd", yp[:, :-2], wb[0],
                        preferred_element_type=jnp.float32)
             + jnp.einsum("btc,cd->btd", yp[:, 1:-1], wb[1],
                          preferred_element_type=jnp.float32)
             + jnp.einsum("btc,cd->btd", yp[:, 2:], wb[2],
                          preferred_element_type=jnp.float32)
             + bb)
        y = mask(y, sl)
    return y, sl


if __name__ == "__main__":
    key = jax.random.PRNGKey(0)
    kx, kr, kp = jax.random.split(key, 3)

    B, T, C_IN, C_UP, C_RES = 2, 8, 16, 16, 16
    CONV_CHANNELS = (32, 16)

    x = jax.random.normal(kx, (B, T, C_IN), jnp.float32)
    residual = jax.random.normal(kr, (B, 2 * T, C_RES), jnp.float32)
    seq_lens = jnp.array([8, 5], jnp.int32)
    params = init_params(kp, C_IN, C_UP, C_RES, CONV_CHANNELS)

    fwd = jax.jit(decoder_block_forward)
    out, out_lens = fwd(params, x, seq_lens, residual)
    out = jax.block_until_ready(out)
    out_lens = jax.block_until_ready(out_lens)

    ref_out, ref_lens = ref_forward(params, x, seq_lens, residual)
    assert out.shape == (B, 2 * T, CONV_CHANNELS[-1]), out.shape
    np.testing.assert_allclose(np.asarray(out), np.asarray(ref_out),
                               atol=2e-2, rtol=2e-2)
    np.testing.assert_array_equal(np.asarray(out_lens), np.asarray(ref_lens))
    print("KERNEL_OK")
</pallas_src>

<mosaic_0001>
module attributes {stable_mosaic.version = 11 : i64} {
  func.func @kernel(%arg0: i32, %arg1: memref<2xi32, #tpu.memory_space<smem>>, %arg2: memref<1x8x16xf32, #tpu.memory_space<vmem>>, %arg3: memref<1x8x32xf32, #tpu.memory_space<vmem>>, %arg4: memref<16x32xbf16, #tpu.memory_space<vmem>>, %arg5: memref<1x32xbf16, #tpu.memory_space<vmem>>, %arg6: memref<96x64xbf16, #tpu.memory_space<vmem>>, %arg7: memref<96x64xbf16, #tpu.memory_space<vmem>>, %arg8: memref<1x64xbf16, #tpu.memory_space<vmem>>, %arg9: memref<192x32xbf16, #tpu.memory_space<vmem>>, %arg10: memref<1x32xbf16, #tpu.memory_space<vmem>>, %arg11: memref<1x8x32xf32, #tpu.memory_space<vmem>>) attributes {dimension_semantics = [#tpu.dimension_semantics<parallel>], iteration_bounds = array<i64: 2>, scalar_prefetch = 1 : i64, scratch_operands = 0 : i64, tpu.core_type = #tpu.core_type<tc>, window_params = [{transform_indices = @transform_0, window_bounds = array<i64: 1, 8, 16>}, {transform_indices = @transform_1, window_bounds = array<i64: 1, 8, 32>}, {pipeline_mode = #tpu.pipeline_mode<synchronous>, transform_indices = @transform_2, window_bounds = array<i64: 16, 32>}, {pipeline_mode = #tpu.pipeline_mode<synchronous>, transform_indices = @transform_3, window_bounds = array<i64: 1, 32>}, {pipeline_mode = #tpu.pipeline_mode<synchronous>, transform_indices = @transform_4, window_bounds = array<i64: 96, 64>}, {pipeline_mode = #tpu.pipeline_mode<synchronous>, transform_indices = @transform_5, window_bounds = array<i64: 96, 64>}, {pipeline_mode = #tpu.pipeline_mode<synchronous>, transform_indices = @transform_6, window_bounds = array<i64: 1, 64>}, {pipeline_mode = #tpu.pipeline_mode<synchronous>, transform_indices = @transform_7, window_bounds = array<i64: 192, 32>}, {pipeline_mode = #tpu.pipeline_mode<synchronous>, transform_indices = @transform_8, window_bounds = array<i64: 1, 32>}, {transform_indices = @transform_9, window_bounds = array<i64: 1, 8, 32>}]} {
    %0 = arith.index_cast %arg0 : i32 to index
    %1 = memref.load %arg1[%0] : memref<2xi32, #tpu.memory_space<smem>>
    %2 = tpu.iota {dimensions = array<i32: 0>} : vector<8x1xi32>
    %3 = vector.broadcast %1 : i32 to vector<8x1xi32>
    %4 = arith.cmpi slt, %2, %3 : vector<8x1xi32>
    %c0_i32 = arith.constant 0 : i32
    %5 = vector.broadcast %c0_i32 : i32 to vector<8x1xi32>
    %6 = arith.cmpi eq, %2, %5 : vector<8x1xi32>
    %c7_i32 = arith.constant 7 : i32
    %7 = vector.broadcast %c7_i32 : i32 to vector<8x1xi32>
    %8 = arith.cmpi eq, %2, %7 : vector<8x1xi32>
    %c0 = arith.constant 0 : index
    %c0_0 = arith.constant 0 : index
    %c0_1 = arith.constant 0 : index
    %9 = vector.load %arg2[%c0, %c0_0, %c0_1] : memref<1x8x16xf32, #tpu.memory_space<vmem>>, vector<1x8x16xf32>
    %10 = vector.shape_cast %9 : vector<1x8x16xf32> to vector<8x16xf32>
    %11 = arith.truncf %10 : vector<8x16xf32> to vector<8x16xbf16>
    %c0_2 = arith.constant 0 : index
    %c0_3 = arith.constant 0 : index
    %12 = vector.load %arg4[%c0_2, %c0_3] : memref<16x32xbf16, #tpu.memory_space<vmem>>, vector<16x32xbf16>
    %cst = arith.constant dense<0.000000e+00> : vector<8x32xf32>
    %13 = tpu.matmul %11, %12, %cst {dimension_numbers = #tpu.dot_dimension_numbers<[1], [0], [0], [1], [0, 0, 1, 1], [], []>} : vector<8x16xbf16>, vector<16x32xbf16>, vector<8x32xf32> -> vector<8x32xf32>
    %c0_4 = arith.constant 0 : index
    %c0_5 = arith.constant 0 : index
    %14 = vector.load %arg5[%c0_4, %c0_5] : memref<1x32xbf16, #tpu.memory_space<vmem>>, vector<1x32xbf16>
    %15 = arith.extf %14 : vector<1x32xbf16> to vector<1x32xf32>
    %16 = vector.broadcast %15 : vector<1x32xf32> to vector<8x32xf32>
    %17 = arith.addf %13, %16 : vector<8x32xf32>
    %cst_6 = arith.constant 0.000000e+00 : f32
    %18 = vector.shape_cast %4 : vector<8x1xi1> to vector<8x1xi1>
    %19 = vector.broadcast %18 : vector<8x1xi1> to vector<8x32xi1>
    %20 = vector.broadcast %cst_6 : f32 to vector<8x32xf32>
    %21 = arith.select %19, %17, %20 : vector<8x32xi1>, vector<8x32xf32>
    %c0_7 = arith.constant 0 : index
    %c0_8 = arith.constant 0 : index
    %c0_9 = arith.constant 0 : index
    %22 = vector.load %arg3[%c0_7, %c0_8, %c0_9] : memref<1x8x32xf32, #tpu.memory_space<vmem>>, vector<1x8x32xf32>
    %23 = vector.shape_cast %22 : vector<1x8x32xf32> to vector<8x32xf32>
    %24 = vector.extract_strided_slice %21 {offsets = [7, 0], sizes = [1, 32], strides = [1, 1]} : vector<8x32xf32> to vector<1x32xf32>
    %25 = vector.extract_strided_slice %21 {offsets = [0, 0], sizes = [7, 32], strides = [1, 1]} : vector<8x32xf32> to vector<7x32xf32>
    %26 = tpu.concatenate %24, %25 in 0 : vector<1x32xf32>, vector<7x32xf32> -> vector<8x32xf32>
    %cst_10 = arith.constant 0.000000e+00 : f32
    %27 = vector.shape_cast %6 : vector<8x1xi1> to vector<8x1xi1>
    %28 = vector.broadcast %27 : vector<8x1xi1> to vector<8x32xi1>
    %29 = vector.broadcast %cst_10 : f32 to vector<8x32xf32>
    %30 = arith.select %28, %29, %26 : vector<8x32xi1>, vector<8x32xf32>
    %31 = vector.extract_strided_slice %21 {offsets = [1, 0], sizes = [7, 32], strides = [1, 1]} : vector<8x32xf32> to vector<7x32xf32>
    %32 = vector.extract_strided_slice %21 {offsets = [0, 0], sizes = [1, 32], strides = [1, 1]} : vector<8x32xf32> to vector<1x32xf32>
    %33 = tpu.concatenate %31, %32 in 0 : vector<7x32xf32>, vector<1x32xf32> -> vector<8x32xf32>
    %cst_11 = arith.constant 0.000000e+00 : f32
    %34 = vector.shape_cast %8 : vector<8x1xi1> to vector<8x1xi1>
    %35 = vector.broadcast %34 : vector<8x1xi1> to vector<8x32xi1>
    %36 = vector.broadcast %cst_11 : f32 to vector<8x32xf32>
    %37 = arith.select %35, %36, %33 : vector<8x32xi1>, vector<8x32xf32>
    %38 = tpu.concatenate %30, %21, %37 in 1 : vector<8x32xf32>, vector<8x32xf32>, vector<8x32xf32> -> vector<8x96xf32>
    %39 = arith.truncf %38 : vector<8x96xf32> to vector<8x96xbf16>
    %c0_12 = arith.constant 0 : index
    %c0_13 = arith.constant 0 : index
    %40 = vector.load %arg6[%c0_12, %c0_13] : memref<96x64xbf16, #tpu.memory_space<vmem>>, vector<96x64xbf16>
    %cst_14 = arith.constant dense<0.000000e+00> : vector<8x64xf32>
    %41 = tpu.matmul %39, %40, %cst_14 {dimension_numbers = #tpu.dot_dimension_numbers<[1], [0], [0], [1], [0, 0, 1, 1], [], []>} : vector<8x96xbf16>, vector<96x64xbf16>, vector<8x64xf32> -> vector<8x64xf32>
    %42 = vector.extract_strided_slice %23 {offsets = [7, 0], sizes = [1, 32], strides = [1, 1]} : vector<8x32xf32> to vector<1x32xf32>
    %43 = vector.extract_strided_slice %23 {offsets = [0, 0], sizes = [7, 32], strides = [1, 1]} : vector<8x32xf32> to vector<7x32xf32>
    %44 = tpu.concatenate %42, %43 in 0 : vector<1x32xf32>, vector<7x32xf32> -> vector<8x32xf32>
    %cst_15 = arith.constant 0.000000e+00 : f32
    %45 = vector.shape_cast %6 : vector<8x1xi1> to vector<8x1xi1>
    %46 = vector.broadcast %45 : vector<8x1xi1> to vector<8x32xi1>
    %47 = vector.broadcast %cst_15 : f32 to vector<8x32xf32>
    %48 = arith.select %46, %47, %44 : vector<8x32xi1>, vector<8x32xf32>
    %49 = vector.extract_strided_slice %23 {offsets = [1, 0], sizes = [7, 32], strides = [1, 1]} : vector<8x32xf32> to vector<7x32xf32>
    %50 = vector.extract_strided_slice %23 {offsets = [0, 0], sizes = [1, 32], strides = [1, 1]} : vector<8x32xf32> to vector<1x32xf32>
    %51 = tpu.concatenate %49, %50 in 0 : vector<7x32xf32>, vector<1x32xf32> -> vector<8x32xf32>
    %cst_16 = arith.constant 0.000000e+00 : f32
    %52 = vector.shape_cast %8 : vector<8x1xi1> to vector<8x1xi1>
    %53 = vector.broadcast %52 : vector<8x1xi1> to vector<8x32xi1>
    %54 = vector.broadcast %cst_16 : f32 to vector<8x32xf32>
    %55 = arith.select %53, %54, %51 : vector<8x32xi1>, vector<8x32xf32>
    %56 = tpu.concatenate %48, %23, %55 in 1 : vector<8x32xf32>, vector<8x32xf32>, vector<8x32xf32> -> vector<8x96xf32>
    %57 = arith.truncf %56 : vector<8x96xf32> to vector<8x96xbf16>
    %c0_17 = arith.constant 0 : index
    %c0_18 = arith.constant 0 : index
    %58 = vector.load %arg7[%c0_17, %c0_18] : memref<96x64xbf16, #tpu.memory_space<vmem>>, vector<96x64xbf16>
    %cst_19 = arith.constant dense<0.000000e+00> : vector<8x64xf32>
    %59 = tpu.matmul %57, %58, %cst_19 {dimension_numbers = #tpu.dot_dimension_numbers<[1], [0], [0], [1], [0, 0, 1, 1], [], []>} : vector<8x96xbf16>, vector<96x64xbf16>, vector<8x64xf32> -> vector<8x64xf32>
    %60 = arith.addf %41, %59 : vector<8x64xf32>
    %c0_20 = arith.constant 0 : index
    %c0_21 = arith.constant 0 : index
    %61 = vector.load %arg8[%c0_20, %c0_21] : memref<1x64xbf16, #tpu.memory_space<vmem>>, vector<1x64xbf16>
    %62 = arith.extf %61 : vector<1x64xbf16> to vector<1x64xf32>
    %63 = vector.broadcast %62 : vector<1x64xf32> to vector<8x64xf32>
    %64 = arith.addf %60, %63 : vector<8x64xf32>
    %cst_22 = arith.constant 0.000000e+00 : f32
    %65 = vector.shape_cast %4 : vector<8x1xi1> to vector<8x1xi1>
    %66 = vector.broadcast %65 : vector<8x1xi1> to vector<8x64xi1>
    %67 = vector.broadcast %cst_22 : f32 to vector<8x64xf32>
    %68 = arith.select %66, %64, %67 : vector<8x64xi1>, vector<8x64xf32>
    %69 = vector.extract_strided_slice %68 {offsets = [7, 0], sizes = [1, 64], strides = [1, 1]} : vector<8x64xf32> to vector<1x64xf32>
    %70 = vector.extract_strided_slice %68 {offsets = [0, 0], sizes = [7, 64], strides = [1, 1]} : vector<8x64xf32> to vector<7x64xf32>
    %71 = tpu.concatenate %69, %70 in 0 : vector<1x64xf32>, vector<7x64xf32> -> vector<8x64xf32>
    %cst_23 = arith.constant 0.000000e+00 : f32
    %72 = vector.shape_cast %6 : vector<8x1xi1> to vector<8x1xi1>
    %73 = vector.broadcast %72 : vector<8x1xi1> to vector<8x64xi1>
    %74 = vector.broadcast %cst_23 : f32 to vector<8x64xf32>
    %75 = arith.select %73, %74, %71 : vector<8x64xi1>, vector<8x64xf32>
    %76 = vector.extract_strided_slice %68 {offsets = [1, 0], sizes = [7, 64], strides = [1, 1]} : vector<8x64xf32> to vector<7x64xf32>
    %77 = vector.extract_strided_slice %68 {offsets = [0, 0], sizes = [1, 64], strides = [1, 1]} : vector<8x64xf32> to vector<1x64xf32>
    %78 = tpu.concatenate %76, %77 in 0 : vector<7x64xf32>, vector<1x64xf32> -> vector<8x64xf32>
    %cst_24 = arith.constant 0.000000e+00 : f32
    %79 = vector.shape_cast %8 : vector<8x1xi1> to vector<8x1xi1>
    %80 = vector.broadcast %79 : vector<8x1xi1> to vector<8x64xi1>
    %81 = vector.broadcast %cst_24 : f32 to vector<8x64xf32>
    %82 = arith.select %80, %81, %78 : vector<8x64xi1>, vector<8x64xf32>
    %83 = tpu.concatenate %75, %68, %82 in 1 : vector<8x64xf32>, vector<8x64xf32>, vector<8x64xf32> -> vector<8x192xf32>
    %84 = arith.truncf %83 : vector<8x192xf32> to vector<8x192xbf16>
    %c0_25 = arith.constant 0 : index
    %c0_26 = arith.constant 0 : index
    %85 = vector.load %arg9[%c0_25, %c0_26] : memref<192x32xbf16, #tpu.memory_space<vmem>>, vector<192x32xbf16>
    %cst_27 = arith.constant dense<0.000000e+00> : vector<8x32xf32>
    %86 = tpu.matmul %84, %85, %cst_27 {dimension_numbers = #tpu.dot_dimension_numbers<[1], [0], [0], [1], [0, 0, 1, 1], [], []>} : vector<8x192xbf16>, vector<192x32xbf16>, vector<8x32xf32> -> vector<8x32xf32>
    %c0_28 = arith.constant 0 : index
    %c0_29 = arith.constant 0 : index
    %87 = vector.load %arg10[%c0_28, %c0_29] : memref<1x32xbf16, #tpu.memory_space<vmem>>, vector<1x32xbf16>
    %88 = arith.extf %87 : vector<1x32xbf16> to vector<1x32xf32>
    %89 = vector.broadcast %88 : vector<1x32xf32> to vector<8x32xf32>
    %90 = arith.addf %86, %89 : vector<8x32xf32>
    %cst_30 = arith.constant 0.000000e+00 : f32
    %91 = vector.shape_cast %4 : vector<8x1xi1> to vector<8x1xi1>
    %92 = vector.broadcast %91 : vector<8x1xi1> to vector<8x32xi1>
    %93 = vector.broadcast %cst_30 : f32 to vector<8x32xf32>
    %94 = arith.select %92, %90, %93 : vector<8x32xi1>, vector<8x32xf32>
    %c0_31 = arith.constant 0 : index
    %c0_32 = arith.constant 0 : index
    %c0_33 = arith.constant 0 : index
    %95 = vector.load %arg11[%c0_31, %c0_32, %c0_33] : memref<1x8x32xf32, #tpu.memory_space<vmem>>, vector<1x8x32xf32>
    %96 = vector.shape_cast %95 : vector<1x8x32xf32> to vector<8x32xf32>
    %97 = vector.shape_cast %94 : vector<8x32xf32> to vector<1x8x32xf32>
    tpu.vector_store %arg11[%c0_31, %c0_32, %c0_33], %97 {strides = array<i32>} : memref<1x8x32xf32, #tpu.memory_space<vmem>>, vector<1x8x32xf32>,
    return
  }
  func.func @transform_0(%arg0: i32, %arg1: memref<2xi32, #tpu.memory_space<smem>>) -> (i32, i32, i32) {
    %c0_i32 = arith.constant 0 : i32
    %c0_i32_0 = arith.constant 0 : i32
    %c0_i32_1 = arith.constant 0 : i32
    return %arg0, %c0_i32, %c0_i32_0 : i32, i32, i32
  }
  func.func @transform_1(%arg0: i32, %arg1: memref<2xi32, #tpu.memory_space<smem>>) -> (i32, i32, i32) {
    %c0_i32 = arith.constant 0 : i32
    %c0_i32_0 = arith.constant 0 : i32
    %c0_i32_1 = arith.constant 0 : i32
    return %arg0, %c0_i32, %c0_i32_0 : i32, i32, i32
  }
  func.func @transform_2(%arg0: i32, %arg1: memref<2xi32, #tpu.memory_space<smem>>) -> (i32, i32) {
    %c0_i32 = arith.constant 0 : i32
    %c0_i32_0 = arith.constant 0 : i32
    %c0_i32_1 = arith.constant 0 : i32
    return %c0_i32, %c0_i32_0 : i32, i32
  }
  func.func @transform_3(%arg0: i32, %arg1: memref<2xi32, #tpu.memory_space<smem>>) -> (i32, i32) {
    %c0_i32 = arith.constant 0 : i32
    %c0_i32_0 = arith.constant 0 : i32
    %c0_i32_1 = arith.constant 0 : i32
    return %c0_i32, %c0_i32_0 : i32, i32
  }
  func.func @transform_4(%arg0: i32, %arg1: memref<2xi32, #tpu.memory_space<smem>>) -> (i32, i32) {
    %c0_i32 = arith.constant 0 : i32
    %c0_i32_0 = arith.constant 0 : i32
    %c0_i32_1 = arith.constant 0 : i32
    return %c0_i32, %c0_i32_0 : i32, i32
  }
  func.func @transform_5(%arg0: i32, %arg1: memref<2xi32, #tpu.memory_space<smem>>) -> (i32, i32) {
    %c0_i32 = arith.constant 0 : i32
    %c0_i32_0 = arith.constant 0 : i32
    %c0_i32_1 = arith.constant 0 : i32
    return %c0_i32, %c0_i32_0 : i32, i32
  }
  func.func @transform_6(%arg0: i32, %arg1: memref<2xi32, #tpu.memory_space<smem>>) -> (i32, i32) {
    %c0_i32 = arith.constant 0 : i32
    %c0_i32_0 = arith.constant 0 : i32
    %c0_i32_1 = arith.constant 0 : i32
    return %c0_i32, %c0_i32_0 : i32, i32
  }
  func.func @transform_7(%arg0: i32, %arg1: memref<2xi32, #tpu.memory_space<smem>>) -> (i32, i32) {
    %c0_i32 = arith.constant 0 : i32
    %c0_i32_0 = arith.constant 0 : i32
    %c0_i32_1 = arith.constant 0 : i32
    return %c0_i32, %c0_i32_0 : i32, i32
  }
  func.func @transform_8(%arg0: i32, %arg1: memref<2xi32, #tpu.memory_space<smem>>) -> (i32, i32) {
    %c0_i32 = arith.constant 0 : i32
    %c0_i32_0 = arith.constant 0 : i32
    %c0_i32_1 = arith.constant 0 : i32
    return %c0_i32, %c0_i32_0 : i32, i32
  }
  func.func @transform_9(%arg0: i32, %arg1: memref<2xi32, #tpu.memory_space<smem>>) -> (i32, i32, i32) {
    %c0_i32 = arith.constant 0 : i32
    %c0_i32_0 = arith.constant 0 : i32
    %c0_i32_1 = arith.constant 0 : i32
    return %arg0, %c0_i32, %c0_i32_0 : i32, i32, i32
  }
}

</mosaic_0001>

<bundles_post_ra>
// kernel: decoder_block_forward.1
= control target key start
LH: loop header
LB: loop body
LE: loop exit
PB: predicated region body
PF: predicated region fallthrough
CT: control target
= control target key end

     0   :  { %s958_s16 = smov [#allocation3]   ;;  %s1172_s0 = inlined_call_operand.vmem [shape: s32[2], index: 0, kind: input, shape index: {}]   ;;  %s1173_s1 = inlined_call_operand.vmem [shape: f32[2,8,16], index: 1, kind: input, shape index: {}]   ;;  %s1174_s2 = inlined_call_operand.vmem [shape: f32[2,8,32], index: 2, kind: input, shape index: {}]   ;;  %s1175_s3 = inlined_call_operand.vmem [shape: bf16[16,32], index: 3, kind: input, shape index: {}]   ;;  %s1176_s4 = inlined_call_operand.vmem [shape: bf16[1,32], index: 4, kind: input, shape index: {}]   ;;  %s1177_s5 = inlined_call_operand.vmem [shape: bf16[96,64], index: 5, kind: input, shape index: {}]   ;;  %s1178_s6 = inlined_call_operand.vmem [shape: bf16[96,64], index: 6, kind: input, shape index: {}]   ;;  %s1179_s7 = inlined_call_operand.vmem [shape: bf16[1,64], index: 7, kind: input, shape index: {}]   ;;  %s1180_s8 = inlined_call_operand.vmem [shape: bf16[192,32], index: 8, kind: input, shape index: {}]   ;;  %s1181_s9 = inlined_call_operand.vmem [shape: bf16[1,32], index: 9, kind: input, shape index: {}]   ;;  %s1182_s10 = inlined_call_operand.vmem [shape: f32[2,8,32], index: 10, kind: output, shape index: {}]  }
   0x1   :  { %s16_s15 = sshll.u32 %s1172_s0, 4  ;;  %s17_s15 = int_to_ptr.vmem [resolvable:$true] %s16_s15 }
   0x2   :  { %19 = dma.vmem_to_smem %s17_s15, 16, %s958_s16, [#allocation2] }
   0x3   :  { %952 = dma.done.wait [#allocation2], 16 }
   0x4   :  { %953 = vsyncadd [#allocation2], 4294967280 }
   0x5   :  { %22 = sfence }
   0x6   :  { %s1019_s17 = smov 0  }
   0x7 LB: > { %s1025_s18 = sadd.s32 4294967295, %s956_s17   ;;  %p790_p0 = scmp.ge.s32.totalorder %s956_s17, 1  ;;  %s956_s17 = sphi %s1019_s17, %s28_s17  }
   0x8   : > { %p304_p1 = scmp.lt.s32.totalorder %s956_s17, 3 }
   0xa   : > { %p305_p2 = pnand %p790_p0, %p304_p1 }
   0xb   : > { %p342_p3 = scmp.lt.s32.totalorder (!%p305_p2), %s1025_s18, 1  ;;  %s959_s28 = smov (!%p305_p2), 32  }
   0xc   : > { %308 = sbr.rel (%p305_p2) target bundleno = 650 (0x28a), region = 56  ;;  %s960_s29 = smov (!%p305_p2), 64  }
  0x11   : > { %v900_v0 = vld [vmem:[%s1175_s3] sm:$0xff]  ;;  %s343_s20 = scalar_select %p342_p3, %s1025_s18, 1  ;;  %vm375_vm0 = vcmask 130048   ;;  %v356_v4 = vlaneseq  ;;  %v912_v8 = vld [vmem:[%s1178_s6 + $0x28] sm:$0xff]  ;;  %v910_v12 = vld [vmem:[%s1178_s6 + $0x18] sm:$0xff]  ;;  %vm418_vm4 = vcmask 261120  }
  0x12   : > { %386 = vmatpush.bf16.msra.mxu0 %v900_v0  ;;  %v906_v9 = vld [vmem:[%s1177_s5 + $0x28] sm:$0xff]  ;;  %508 = vmatpush.bf16.msra.mxu1 %v912_v8  ;;  %v911_v10 = vld [vmem:[%s1178_s6 + $0x20] sm:$0xff]  ;;  %v904_v13 = vld [vmem:[%s1177_s5 + $0x18] sm:$0xff]  ;;  %vm420_vm5 = vcmask 523264   ;;  %vm502_vm6 = vcmask 785408  }
  0x13   : > { %s1034_s21 = sshll.u32 %s343_s20, 3  ;;  %v1045_v5 = vshrl.u32 %v356_v4, 7  ;;  %560 = vmatpush.bf16.msra.mxu2 %v906_v9  ;;  %v905_v11 = vld [vmem:[%s1177_s5 + $0x20] sm:$0xff]  ;;  %v909_v15 = vld [vmem:[%s1178_s6 + $0x10] sm:$0xff]  ;;  %v908_v17 = vld [vmem:[%s1178_s6 + $0x8] sm:$0xff] }
  0x14   : > { %s345_s24 = scalar_lea.vmem %s1173_s1, %s1034_s21  ;;  %s349_s27 = scalar_lea.vmem %s1174_s2, %s1034_s21  ;;  %v366_v14 = vld [vmem:[%s1176_s4] sm:$0x1]  ;;  %v903_v33 = vld [vmem:[%s1177_s5 + $0x10] sm:$0xff]  ;;  %v902_v36 = vld [vmem:[%s1177_s5 + $0x8] sm:$0xff] }
  0x15   : > { %v362_v1 = vld [vmem:[%s345_s24] sm:$0xff]  ;;  %vm361_vm1 = vcmp.eq.s32.totalorder %v1045_v5, 7  ;;  %s355_s24 = sld [smem:[#allocation3 + %s1025_s18]]  ;;  %v367_v16 = vunpack.c.l.bf16 %v366_v14  ;;  %vm360_vm3 = vcmp.eq.s32.totalorder %v1045_v5, 0  ;;  %v924_v45 = vld [vmem:[%s1180_s8 + $0x58] sm:$0xff]  ;;  %v923_v48 = vld [vmem:[%s1180_s8 + $0x50] sm:$0xff]  ;;  %s353_s13 = scalar_lea.vmem %s1182_s10, %s1034_s21 }
  0x16   : > { %v395_v2 = vld [vmem:[%s349_s27] sm:$0xff]  ;;  %v363_v3 = vpack.c.bf16 %v362_v1, %v362_v1  ;;  %509 = vmatpush.bf16.msra.mxu1 %v911_v10  ;;  %710 = vmatpush.bf16.msrb.mxu0 %v924_v45  ;;  %v922_v49 = vld [vmem:[%s1180_s8 + $0x48] sm:$0xff]  ;;  %v920_v51 = vld [vmem:[%s1180_s8 + $0x38] sm:$0xff] }
  0x17   : > { %444 = vrot.lane.b32.xlu1 %v395_v2, %s959_s28  ;;  %v440_v6 = vrot.slane %v395_v2, 1  ;;  %561 = vmatpush.bf16.msra.mxu2 %v905_v11  ;;  %v368_v18 = vperm.slane %v367_v16, 0  ;;  %v907_v27 = vld [vmem:[%s1178_s6] sm:$0xff]  ;;  %v436_v29 = vrot.slane %v395_v2, 7  ;;  %v919_v52 = vld [vmem:[%s1180_s8 + $0x30] sm:$0xff]  ;;  %v918_v53 = vld [vmem:[%s1180_s8 + $0x28] sm:$0xff] }
  0x18   : > { %798 = vmatmul.msk.bf16.vlgmr.msra.gmra.mxu0 %vm375_vm0, %v363_v3  ;;  %v901_v37 = vld [vmem:[%s1177_s5] sm:$0xff]  ;;  %693 = vmatpush.bf16.msra.mxu3 %v920_v51  ;;  %v916_v56 = vld [vmem:[%s1180_s8 + $0x18] sm:$0xff]  ;;  %v915_v58 = vld [vmem:[%s1180_s8 + $0x10] sm:$0xff] }
  0x19   : > { %v443_v7 = vsel %vm361_vm1, 0.0, %v440_v6  ;;  %v439_v30 = vsel %vm360_vm3, 0.0, %v436_v29  ;;  %v921_v50 = vld [vmem:[%s1180_s8 + $0x40] sm:$0xff]  ;;  %v914_v62 = vld [vmem:[%s1180_s8 + $0x8] sm:$0xff] }
  0x1a   : > { %510 = vmatpush.bf16.msra.mxu1 %v910_v12  ;;  %711 = vmatpush.bf16.msrb.mxu0 %v923_v48  ;;  %v917_v54 = vld [vmem:[%s1180_s8 + $0x20] sm:$0xff] }
  0x1b   : > { %562 = vmatpush.bf16.msra.mxu2 %v904_v13  ;;  %v358_v19 = vstv %s355_s24  ;;  %v571_v55 = vld [vmem:[%s1179_s7] sm:$0x1] }
  0x1c   : > { %vm1080_vm2 = vcmp.lt.s32.totalorder %v1045_v5, %v358_v19  ;;  %694 = vmatpush.bf16.msra.mxu3 %v919_v52  ;;  %v572_v57 = vunpack.c.l.bf16 %v571_v55  ;;  %v913_v6 = vld [vmem:[%s1180_s8] sm:$0xff] }
  0x1d   : > { %v615_v14 = vld [vmem:[%s1181_s9] sm:$0x1] }
  0x1e   : > { %511 = vmatpush.bf16.msra.mxu1 %v909_v15  ;;  %712 = vmatpush.bf16.msrb.mxu0 %v922_v49  ;;  %v573_v59 = vperm.slane %v572_v57, 0  ;;  %v616_v15 = vunpack.c.l.bf16 %v615_v14 }
  0x1f   : > { %448 = vrot.lane.b32.xlu1 %v443_v7, %s960_s29  ;;  %563 = vmatpush.bf16.msra.mxu2 %v903_v33 }
  0x20   : > { %695 = vmatpush.bf16.msra.mxu3 %v918_v53  ;;  %v617_v16 = vperm.slane %v616_v15, 0 }
  0x22   : > { %512 = vmatpush.bf16.msra.mxu1 %v908_v17  ;;  %713 = vmatpush.bf16.msrb.mxu0 %v921_v50 }
  0x23   : > { %564 = vmatpush.bf16.msra.mxu2 %v902_v36 }
  0x24   : > { %696 = vmatpush.bf16.msra.mxu3 %v917_v54 }
  0x26   : > { %513 = vmatpush.bf16.msra.mxu1 %v907_v27 }
  0x27   : > { %565 = vmatpush.bf16.msra.mxu2 %v901_v37 }
  0x28   : > { %697 = vmatpush.bf16.msra.mxu3 %v916_v56 }
  0x2c   : > { %698 = vmatpush.bf16.msra.mxu3 %v915_v58 }
  0x30   : > { %699 = vmatpush.bf16.msra.mxu3 %v914_v62 }
  0x34   : > { %700 = vmatpush.bf16.msra.mxu3 %v913_v6 }
  0x89   : > { %v445_v28 = vpop.permute.xlu1 %444 }
  0x8a   : > { %v451_v31 = vsel %vm418_vm4, %v439_v30, %v445_v28 }
  0x91   : > { %v449_v32 = vpop.permute.xlu1 %448 }
  0x92   : > { %v452_v34 = vsel %vm420_vm5, %v451_v31, %v449_v32 }
  0x93   : > { %v453_v35 = vpack.c.bf16 %v452_v34, %v452_v34 }
  0x95   : > { %v388_v20 = vpop.f32.mrf.mxu0  ;;  %823 = vmatmul.msk.bf16.vlgmr.msra.gmra.mxu1 %vm502_vm6, %v453_v35 }
  0x96   : > { %v389_v22 = vadd.f32 %v388_v20, %v368_v18 }
  0x98   : > { %v394_v23 = vsel %vm1080_vm2, %v389_v22, 0.0 }
  0x99   : > { %411 = vrot.lane.b32.xlu0 %v394_v23, %s959_s28  ;;  %v404_v24 = vrot.slane %v394_v23, 1  ;;  %v397_v39 = vrot.slane %v394_v23, 7 }
  0x9b   : > { %v410_v26 = vsel %vm361_vm1, 0.0, %v404_v24  ;;  %v403_v40 = vsel %vm360_vm3, 0.0, %v397_v39 }
  0x9d   : > { %v390_v25 = vpop.f32.mrf.mxu0 }
  0xa1   : > { %415 = vrot.lane.b32.xlu0 %v410_v26, %s960_s29 }
 0x10b   : > { %v412_v38 = vpop.permute.xlu0 %411 }
 0x10c   : > { %v419_v41 = vsel %vm418_vm4, %v403_v40, %v412_v38 }
 0x112   : > { %v515_v46 = vpop.f32.mrf.mxu1 }
 0x113   : > { %v416_v42 = vpop.permute.xlu0 %415 }
 0x114   : > { %v421_v43 = vsel %vm420_vm5, %v419_v41, %v416_v42 }
 0x115   : > { %v422_v44 = vpack.c.bf16 %v421_v43, %v421_v43 }
 0x117   : > { %848 = vmatmul.msk.bf16.vlgmr.msra.gmra.mxu2 %vm502_vm6, %v422_v44 }
 0x11a   : > { %v517_v47 = vpop.f32.mrf.mxu1 }
 0x19a   : > { %v567_v60 = vpop.f32.mrf.mxu2 }
 0x19b   : > { %v568_v61 = vadd.f32 %v567_v60, %v515_v46 }
 0x19d   : > { %v574_v63 = vadd.f32 %v573_v59, %v568_v61 }
 0x19f   : > { %v575_v0 = vsel %vm1080_vm2, %v574_v63, 0.0 }
 0x1a0   : > { %585 = vrot.lane.b32.xlu2 %v575_v0, %s960_s29  ;;  %v581_v1 = vrot.slane %v575_v0, 1  ;;  %v577_v7 = vrot.slane %v575_v0, 7 }
 0x1a2   : > { %v584_v2 = vsel %vm361_vm1, 0.0, %v581_v1  ;;  %v569_v3 = vpop.f32.mrf.mxu2  ;;  %v580_v9 = vsel %vm360_vm3, 0.0, %v577_v7 }
 0x1a3   : > { %v590_v4 = vpack.c.bf16 %v584_v2, %v584_v2 }
 0x1a5   : > { %897 = vmatmul.msk.bf16.vlgmr.msrb.gmra.mxu0 %vm420_vm5, %v590_v4 }
 0x1fa   : > { %v586_v8 = vpop.permute.xlu2 %585 }
 0x1fb   : > { %v588_v10 = vsel %vm420_vm5, %v580_v9, %v586_v8 }
 0x1fc   : > { %v589_v11 = vpack.c.bf16 %v588_v10, %v588_v10 }
 0x1fe   : > { %701 = vmatmul.bf16.vlgmr.msra.gmra.mxu3 %v589_v11 }
 0x222   : > { %v715_v12 = vpop.f32.mrf.mxu0 }
 0x22a   : > { %v717_v13 = vpop.f32.mrf.mxu0 }
 0x281   : > { %v702_v17 = vpop.f32.mrf.mxu3 }
 0x282   : > { %v703_v18 = vadd.f32 %v702_v17, %v617_v16 }
 0x284   : > { %v716_v5 = vadd.f32 %v715_v12, %v703_v18 }
 0x286   : > { %v719_v19 = vsel %vm1080_vm2, %v716_v5, 0.0 }
 0x287   : > { %720 = vst.msk [vmem:[%s353_s13] sm:$0xff] %vm418_vm4, %v719_v19 }
 0x289   : > { %v704_v20 = vpop.f32.mrf.mxu3 }
 0x28a PF: > { %s28_s17 = sadd.s32 1, %s956_s17  }
 0x28b   : > { %p25_p4 = scmp.ge.s32.totalorder %s28_s17, 4  }
 0x28d   :  { %27 = sbr.rel (!%p25_p4) target bundleno = 7 (0x7), region = 89 }

</bundles_post_ra>
